<compile_context>
chip_gen: v6e
topology: v6e:2x2x1
jax: 0.10.0
libtpu: 0.0.40
codegen_flags: <defaults>
</compile_context>

<pallas_src>
import functools

import jax
import jax.numpy as jnp
from jax.experimental import pallas as pl
from jax.experimental.pallas import tpu as pltpu


def _round_up(v, m):
    return ((v + m - 1) // m) * m


def _round_down(v, m):
    return (v // m) * m


# ---------------------------------------------------------------------------
# Kernel bodies
# ---------------------------------------------------------------------------
def _ln_relu_w2(h, gamma, beta, w2, b2):
    """LayerNorm (f32, eps=1e-5) -> Dropout(identity, eval) -> ReLU -> W2."""
    mean = jnp.mean(h, axis=-1, keepdims=True)
    centered = h - mean
    var = jnp.mean(centered * centered, axis=-1, keepdims=True)
    h_ln = centered * jax.lax.rsqrt(var + 1e-5) * gamma + beta
    h_act = jnp.maximum(h_ln, 0.0)
    return jnp.dot(h_act.astype(w2.dtype), w2,
                   preferred_element_type=jnp.float32) + b2


def _fused_kernel(has_mask, *refs):
    """Monolithic path: whole hidden dim resident; one grid axis over batch."""
    if has_mask:
        (x_ref, w1_ref, b1_ref, g_ref, be_ref, w2_ref, b2_ref, m_ref,
         out_ref) = refs
    else:
        (x_ref, w1_ref, b1_ref, g_ref, be_ref, w2_ref, b2_ref, out_ref) = refs
        m_ref = None

    h = jnp.dot(x_ref[...], w1_ref[...],
                preferred_element_type=jnp.float32) + b1_ref[...]
    out = _ln_relu_w2(h, g_ref[...], be_ref[...], w2_ref[...], b2_ref[...])
    if m_ref is not None:
        out = out * m_ref[...].astype(jnp.float32)
    out_ref[...] = out.astype(out_ref.dtype)


def _fused_kernel_ktiled(has_mask, *refs):
    """Large-H path: W1 streamed in (TK, H) blocks, f32 accumulator scratch."""
    if has_mask:
        (x_ref, w1_ref, b1_ref, g_ref, be_ref, w2_ref, b2_ref, m_ref,
         out_ref, h_acc) = refs
    else:
        (x_ref, w1_ref, b1_ref, g_ref, be_ref, w2_ref, b2_ref,
         out_ref, h_acc) = refs
        m_ref = None

    k = pl.program_id(1)

    @pl.when(k == 0)
    def _():
        h_acc[...] = jnp.zeros_like(h_acc)

    h_acc[...] += jnp.dot(x_ref[...], w1_ref[...],
                          preferred_element_type=jnp.float32)

    @pl.when(k == pl.num_programs(1) - 1)
    def _():
        h = h_acc[...] + b1_ref[...]
        out = _ln_relu_w2(h, g_ref[...], be_ref[...], w2_ref[...], b2_ref[...])
        if m_ref is not None:
            out = out * m_ref[...].astype(jnp.float32)
        out_ref[...] = out.astype(out_ref.dtype)


# ---------------------------------------------------------------------------
# Tile selection (VMEM-budget aware)
# ---------------------------------------------------------------------------
def _pick_tiles(B, H, C_pad, has_mask, compute_dtype, out_dtype, block_b,
                k_block, budget):
    """Choose batch tile TB (and K tile TK for the streamed-W1 path)."""
    x_item = jnp.dtype(compute_dtype).itemsize
    w_item = x_item
    o_item = jnp.dtype(out_dtype).itemsize
    m_item = x_item if has_mask else 0

    B8 = _round_up(B, 8)
    TB = max(8, min(_round_up(block_b, 8), B8))
    # Keep >=2 batch grid steps when possible so dimension_semantics=
    # ("parallel",) can shard the batch axis across v7x's two TensorCores.
    if B8 > 8:
        TB = min(TB, _round_up(-(-B8 // 2), 8))

    # Per batch-row VMEM cost: double-buffered x/out/mask streams plus f32
    # intermediates (h, h_ln/h_act, out accumulator).
    per_row = (2 * H * x_item + 2 * C_pad * o_item + 2 * C_pad * m_item
               + 3 * H * 4 + C_pad * 4)
    small_bytes = H * C_pad * w_item + (3 * H + C_pad) * 4   # W2 + vectors
    w1_bytes = H * H * w_item

    use_ktile = k_block is not None
    if not use_ktile:
        avail = budget - (w1_bytes + small_bytes)
        if avail < 8 * per_row:          # W1 cannot stay resident -> stream it
            use_ktile = True
        else:
            TB = min(TB, max(8, _round_down(avail // per_row, 8)))

    if not use_ktile:
        return TB, None

    TK = k_block if k_block is not None else 512
    TK = min(TK, H)
    if TK != H:
        TK = max(128, _round_down(TK, 128))
        while H % TK:
            TK -= 128
            if TK < 128:
                # TODO(synk): ragged K (H not a multiple of 128) would need a
                # masked partial-K block; fall back to a single K step.
                TK = H
                break
    per_row_k = (2 * TK * x_item + 2 * C_pad * o_item + 2 * C_pad * m_item
                 + 4 * H * 4 + C_pad * 4)            # includes h_acc scratch
    resident_k = 2 * TK * H * w_item + small_bytes   # W1 blocks double-buffered
    avail = budget - resident_k
    if avail > 8 * per_row_k:
        TB = min(TB, max(8, _round_down(avail // per_row_k, 8)))
    else:
        TB = 8
    return TB, TK


# ---------------------------------------------------------------------------
# Wrapper
# ---------------------------------------------------------------------------
def classifier_layer(x, params, mask=None, mode=None, *, block_b=512,
                     compute_dtype=jnp.bfloat16, out_dtype=jnp.float32,
                     k_block=None):
    """Pallas wrapper mirroring ClassifierLayer.forward.

    x: [B, H] float32.  mode=None -> cls(x);  mode='weight' -> cls(x) * mask.
    compute_dtype: matmul-operand dtype (default bf16; f32 for exact path).
    Precondition: H should be a multiple of 128 (256 on v6e/v7x) for
    efficiency; H is never padded here (LayerNorm statistics).
    """
    if mode not in (None, "weight"):
        raise ValueError(f"unsupported mode: {mode}")
    if mode == "weight" and mask is None:
        raise ValueError("mode='weight' requires a mask")

    w1, b1, gamma, beta, w2, b2 = params
    B, H = x.shape
    C = w2.shape[1]
    has_mask = mode == "weight"

    # --- lane-pad num_classes (unmasked lane-dense stores, MXU-friendly N) ---
    C_pad = _round_up(max(C, 128), 128)
    if C_pad != C:
        w2 = jnp.pad(w2, ((0, 0), (0, C_pad - C)))
        b2 = jnp.pad(b2, ((0, 0), (0, C_pad - C)))

    # --- mixed precision: cast matmul operands in the wrapper (once) --------
    w1 = w1.astype(compute_dtype)
    w2 = w2.astype(compute_dtype)
    x = x.astype(compute_dtype)
    b1 = b1.astype(jnp.float32)
    gamma = gamma.astype(jnp.float32)
    beta = beta.astype(jnp.float32)
    b2 = b2.astype(jnp.float32)

    # --- VMEM budget (v7x: 64 MiB/TC; v5e/v6e: 128 MiB) ----------------------
    try:
        vmem_cap = pltpu.get_tpu_info().vmem_capacity_bytes
    except Exception:
        vmem_cap = 64 << 20                      # conservative (v7x)
    budget = int(min(vmem_cap, 128 << 20) * 0.8)
    vmem_limit = int(min(vmem_cap * 0.9, 100 << 20))

    TB, TK = _pick_tiles(B, H, C_pad, has_mask, compute_dtype, out_dtype,
                         block_b, k_block, budget)
    use_ktile = TK is not None

    # --- pad batch to a multiple of TB ---------------------------------------
    B_pad = _round_up(B, TB)
    if B_pad != B:
        x = jnp.pad(x, ((0, B_pad - B), (0, 0)))

    operands = [x, w1, b1, gamma, beta, w2, b2]
    if has_mask:
        mask_p = jnp.pad(mask.astype(compute_dtype),
                         ((0, B_pad - B), (0, C_pad - C)))
        operands.append(mask_p)

    bytes_accessed = (
        x.size * x.dtype.itemsize
        + w1.size * w1.dtype.itemsize
        + w2.size * w2.dtype.itemsize
        + (b1.size + gamma.size + beta.size + b2.size) * 4
        + B_pad * C_pad * jnp.dtype(out_dtype).itemsize
        + (operands[-1].size * operands[-1].dtype.itemsize if has_mask else 0)
    )
    cost = pl.CostEstimate(
        flops=2 * B_pad * H * H + 2 * B_pad * H * C_pad,
        transcendentals=B_pad,
        bytes_accessed=int(bytes_accessed),
    )

    def _build(single_buffer_weights):
        if use_ktile:
            res_map = lambda i, k: (0, 0)
        else:
            res_map = lambda i: (0, 0)

        def res_spec(shape):
            # Weights/biases see the same block every grid step (VMEM
            # resident); single-buffering halves their VMEM footprint.
            if single_buffer_weights:
                return pl.BlockSpec(shape, res_map,
                                    pipeline_mode=pl.Buffered(1))
            return pl.BlockSpec(shape, res_map)

        if not use_ktile:
            grid = (B_pad // TB,)
            batched = lambda i: (i, 0)
            in_specs = [
                pl.BlockSpec((TB, H), batched),      # x (streamed per tile)
                res_spec((H, H)),                    # W1
                res_spec((1, H)),                    # b1
                res_spec((1, H)),                    # gamma
                res_spec((1, H)),                    # beta
                res_spec((H, C_pad)),                # W2 (lane-padded)
                res_spec((1, C_pad)),                # b2
            ]
            if has_mask:
                in_specs.append(pl.BlockSpec((TB, C_pad), batched))
            out_specs = pl.BlockSpec((TB, C_pad), batched)
            kernel = functools.partial(_fused_kernel, has_mask)
            scratch = []
            dims = ("parallel",)
        else:
            grid = (B_pad // TB, H // TK)            # reduction axis last
            in_specs = [
                pl.BlockSpec((TB, TK), lambda i, k: (i, k)),   # x
                pl.BlockSpec((TK, H), lambda i, k: (k, 0)),    # W1 (streamed)
                res_spec((1, H)),                              # b1
                res_spec((1, H)),                              # gamma
                res_spec((1, H)),                              # beta
                res_spec((H, C_pad)),                          # W2
                res_spec((1, C_pad)),                          # b2
            ]
            if has_mask:
                in_specs.append(pl.BlockSpec((TB, C_pad), lambda i, k: (i, 0)))
            out_specs = pl.BlockSpec((TB, C_pad), lambda i, k: (i, 0))
            kernel = functools.partial(_fused_kernel_ktiled, has_mask)
            scratch = [pltpu.VMEM((TB, H), jnp.float32)]
            dims = ("parallel", "arbitrary")

        return pl.pallas_call(
            kernel,
            out_shape=jax.ShapeDtypeStruct((B_pad, C_pad), out_dtype),
            grid=grid,
            in_specs=in_specs,
            out_specs=out_specs,
            scratch_shapes=scratch,
            compiler_params=pltpu.CompilerParams(
                dimension_semantics=dims,
                vmem_limit_bytes=vmem_limit,
            ),
            cost_estimate=cost,
        )(*operands)

    try:
        out = _build(single_buffer_weights=True)
    except Exception:
        # pl.Buffered(1) unsupported on this jax/Mosaic version -> default.
        out = _build(single_buffer_weights=False)

    return out[:B, :C]


# ---------------------------------------------------------------------------
# Params + reference
# ---------------------------------------------------------------------------
def init_params(key, hidden_size, num_classes):
    """Deterministic parameter init (shapes match the PyTorch module)."""
    k1, k2, k3, k4 = jax.random.split(key, 4)
    lim = 1.0 / jnp.sqrt(hidden_size)
    w1 = jax.random.uniform(k1, (hidden_size, hidden_size), jnp.float32, -lim, lim)
    b1 = jax.random.uniform(k2, (1, hidden_size), jnp.float32, -lim, lim)
    gamma = jnp.ones((1, hidden_size), jnp.float32)     # LayerNorm weight
    beta = jnp.zeros((1, hidden_size), jnp.float32)     # LayerNorm bias
    w2 = jax.random.uniform(k3, (hidden_size, num_classes), jnp.float32, -lim, lim)
    b2 = jax.random.uniform(k4, (1, num_classes), jnp.float32, -lim, lim)
    return (w1, b1, gamma, beta, w2, b2)


def _reference(x, params, mask=None, mode=None):
    """Plain-JAX reference for correctness checking (f32)."""
    w1, b1, gamma, beta, w2, b2 = params
    h = x @ w1 + b1
    mean = jnp.mean(h, axis=-1, keepdims=True)
    var = jnp.mean((h - mean) ** 2, axis=-1, keepdims=True)
    h = (h - mean) * jax.lax.rsqrt(var + 1e-5) * gamma + beta
    h = jnp.maximum(h, 0.0)
    out = h @ w2 + b2
    if mode == "weight":
        out = out * mask
    return out


if __name__ == "__main__":
    B, H, C = 8, 32, 8  # batch, hidden_size, num_classes

    key = jax.random.PRNGKey(0)
    kx, kp, km, kx2, kp2, kx3 = jax.random.split(key, 6)
    x = jax.random.normal(kx, (B, H), jnp.float32)
    params = init_params(kp, H, C)
    mask = jax.random.bernoulli(km, 0.5, (B, C)).astype(jnp.float32)
    ref = _reference(x, params)

    # 1) default path: bf16 matmul operands, f32 accumulation / LayerNorm
    out = jax.block_until_ready(classifier_layer(x, params))
    assert out.shape == (B, C)
    assert jnp.allclose(out, ref, atol=2e-2, rtol=2e-2)

    # 2) exact f32 path
    out_f32 = jax.block_until_ready(
        classifier_layer(x, params, compute_dtype=jnp.float32))
    assert jnp.allclose(out_f32, ref, atol=1e-5, rtol=1e-5)

    # 3) mode='weight' (mask fused into the kernel epilogue)
    out_w = jax.block_until_ready(
        classifier_layer(x, params, mask=mask, mode="weight"))
    ref_w = _reference(x, params, mask=mask, mode="weight")
    assert jnp.allclose(out_w, ref_w, atol=2e-2, rtol=2e-2)

    # 4) ragged batch, multi-step batch grid (B=20, TB=8 -> grid=(3,), padded)
    x2 = jax.random.normal(kx2, (20, H), jnp.float32)
    out2 = jax.block_until_ready(classifier_layer(x2, params, block_b=8))
    ref2 = _reference(x2, params)
    assert out2.shape == (20, C)
    assert jnp.allclose(out2, ref2, atol=2e-2, rtol=2e-2)

    # 5) K-tiled (streamed-W1) large-H fallback path, forced at H=256, TK=128
    H2 = 256
    params2 = init_params(kp2, H2, C)
    x3 = jax.random.normal(kx3, (16, H2), jnp.float32)
    out3 = jax.block_until_ready(
        classifier_layer(x3, params2, k_block=128, compute_dtype=jnp.float32))
    ref3 = _reference(x3, params2)
    assert out3.shape == (16, C)
    assert jnp.allclose(out3, ref3, atol=1e-3, rtol=1e-3)

    print("KERNEL_OK")
</pallas_src>

<mosaic_0001>
module attributes {stable_mosaic.version = 11 : i64} {
  func.func @_fused_kernel(%arg0: i32, %arg1: memref<8x32xbf16, #tpu.memory_space<vmem>>, %arg2: memref<32x32xbf16, #tpu.memory_space<vmem>>, %arg3: memref<1x32xf32, #tpu.memory_space<vmem>>, %arg4: memref<1x32xf32, #tpu.memory_space<vmem>>, %arg5: memref<1x32xf32, #tpu.memory_space<vmem>>, %arg6: memref<32x128xbf16, #tpu.memory_space<vmem>>, %arg7: memref<1x128xf32, #tpu.memory_space<vmem>>, %arg8: memref<8x128xf32, #tpu.memory_space<vmem>>) attributes {dimension_semantics = [#tpu.dimension_semantics<parallel>], iteration_bounds = array<i64: 1>, scalar_prefetch = 0 : i64, scratch_operands = 0 : i64, tpu.core_type = #tpu.core_type<tc>, window_params = [{transform_indices = @transform_0, window_bounds = array<i64: 8, 32>}, {pipeline_mode = #tpu.pipeline_mode<synchronous>, transform_indices = @transform_1, window_bounds = array<i64: 32, 32>}, {pipeline_mode = #tpu.pipeline_mode<synchronous>, transform_indices = @transform_2, window_bounds = array<i64: 1, 32>}, {pipeline_mode = #tpu.pipeline_mode<synchronous>, transform_indices = @transform_3, window_bounds = array<i64: 1, 32>}, {pipeline_mode = #tpu.pipeline_mode<synchronous>, transform_indices = @transform_4, window_bounds = array<i64: 1, 32>}, {pipeline_mode = #tpu.pipeline_mode<synchronous>, transform_indices = @transform_5, window_bounds = array<i64: 32, 128>}, {pipeline_mode = #tpu.pipeline_mode<synchronous>, transform_indices = @transform_6, window_bounds = array<i64: 1, 128>}, {transform_indices = @transform_7, window_bounds = array<i64: 8, 128>}]} {
    %c0 = arith.constant 0 : index
    %c0_0 = arith.constant 0 : index
    %0 = vector.load %arg1[%c0, %c0_0] : memref<8x32xbf16, #tpu.memory_space<vmem>>, vector<8x32xbf16>
    %c0_1 = arith.constant 0 : index
    %c0_2 = arith.constant 0 : index
    %1 = vector.load %arg2[%c0_1, %c0_2] : memref<32x32xbf16, #tpu.memory_space<vmem>>, vector<32x32xbf16>
    %cst = arith.constant dense<0.000000e+00> : vector<8x32xf32>
    %2 = tpu.matmul %0, %1, %cst {dimension_numbers = #tpu.dot_dimension_numbers<[1], [0], [0], [1], [0, 0, 1, 1], [], []>} : vector<8x32xbf16>, vector<32x32xbf16>, vector<8x32xf32> -> vector<8x32xf32>
    %c0_3 = arith.constant 0 : index
    %c0_4 = arith.constant 0 : index
    %3 = vector.load %arg3[%c0_3, %c0_4] : memref<1x32xf32, #tpu.memory_space<vmem>>, vector<1x32xf32>
    %4 = vector.broadcast %3 : vector<1x32xf32> to vector<8x32xf32>
    %5 = arith.addf %2, %4 : vector<8x32xf32>
    %c0_5 = arith.constant 0 : index
    %c0_6 = arith.constant 0 : index
    %6 = vector.load %arg4[%c0_5, %c0_6] : memref<1x32xf32, #tpu.memory_space<vmem>>, vector<1x32xf32>
    %c0_7 = arith.constant 0 : index
    %c0_8 = arith.constant 0 : index
    %7 = vector.load %arg5[%c0_7, %c0_8] : memref<1x32xf32, #tpu.memory_space<vmem>>, vector<1x32xf32>
    %c0_9 = arith.constant 0 : index
    %c0_10 = arith.constant 0 : index
    %8 = vector.load %arg6[%c0_9, %c0_10] : memref<32x128xbf16, #tpu.memory_space<vmem>>, vector<32x128xbf16>
    %c0_11 = arith.constant 0 : index
    %c0_12 = arith.constant 0 : index
    %9 = vector.load %arg7[%c0_11, %c0_12] : memref<1x128xf32, #tpu.memory_space<vmem>>, vector<1x128xf32>
    %cst_13 = arith.constant dense<0.000000e+00> : vector<8xf32>
    %10 = vector.multi_reduction <add>, %5, %cst_13 [1] : vector<8x32xf32> to vector<8xf32>
    %11 = vector.shape_cast %10 : vector<8xf32> to vector<8x1xf32>
    %cst_14 = arith.constant 3.200000e+01 : f32
    %12 = vector.broadcast %cst_14 : f32 to vector<8x1xf32>
    %13 = arith.divf %11, %12 : vector<8x1xf32>
    %14 = vector.broadcast %13 : vector<8x1xf32> to vector<8x32xf32>
    %15 = arith.subf %5, %14 : vector<8x32xf32>
    %16 = arith.mulf %15, %15 : vector<8x32xf32>
    %cst_15 = arith.constant dense<0.000000e+00> : vector<8xf32>
    %17 = vector.multi_reduction <add>, %16, %cst_15 [1] : vector<8x32xf32> to vector<8xf32>
    %18 = vector.shape_cast %17 : vector<8xf32> to vector<8x1xf32>
    %cst_16 = arith.constant 3.200000e+01 : f32
    %19 = vector.broadcast %cst_16 : f32 to vector<8x1xf32>
    %20 = arith.divf %18, %19 : vector<8x1xf32>
    %cst_17 = arith.constant 9.99999974E-6 : f32
    %21 = vector.broadcast %cst_17 : f32 to vector<8x1xf32>
    %22 = arith.addf %20, %21 : vector<8x1xf32>
    %23 = math.rsqrt %22 : vector<8x1xf32>
    %24 = vector.broadcast %23 : vector<8x1xf32> to vector<8x32xf32>
    %25 = arith.mulf %15, %24 : vector<8x32xf32>
    %26 = vector.broadcast %6 : vector<1x32xf32> to vector<8x32xf32>
    %27 = arith.mulf %25, %26 : vector<8x32xf32>
    %28 = vector.broadcast %7 : vector<1x32xf32> to vector<8x32xf32>
    %29 = arith.addf %27, %28 : vector<8x32xf32>
    %cst_18 = arith.constant 0.000000e+00 : f32
    %30 = vector.broadcast %cst_18 : f32 to vector<8x32xf32>
    %31 = arith.maximumf %29, %30 : vector<8x32xf32>
    %32 = arith.truncf %31 : vector<8x32xf32> to vector<8x32xbf16>
    %cst_19 = arith.constant dense<0.000000e+00> : vector<8x128xf32>
    %33 = tpu.matmul %32, %8, %cst_19 {dimension_numbers = #tpu.dot_dimension_numbers<[1], [0], [0], [1], [0, 0, 1, 1], [], []>} : vector<8x32xbf16>, vector<32x128xbf16>, vector<8x128xf32> -> vector<8x128xf32>
    %34 = vector.broadcast %9 : vector<1x128xf32> to vector<8x128xf32>
    %35 = arith.addf %33, %34 : vector<8x128xf32>
    %c0_20 = arith.constant 0 : index
    %c0_21 = arith.constant 0 : index
    %36 = vector.load %arg8[%c0_20, %c0_21] : memref<8x128xf32, #tpu.memory_space<vmem>>, vector<8x128xf32>
    tpu.vector_store %arg8[%c0_20, %c0_21], %35 {strides = array<i32>} : memref<8x128xf32, #tpu.memory_space<vmem>>, vector<8x128xf32>,
    return
  }
  func.func @transform_0(%arg0: i32) -> (i32, i32) {
    %c0_i32 = arith.constant 0 : i32
    %c0_i32_0 = arith.constant 0 : i32
    return %arg0, %c0_i32 : i32, i32
  }
  func.func @transform_1(%arg0: i32) -> (i32, i32) {
    %c0_i32 = arith.constant 0 : i32
    %c0_i32_0 = arith.constant 0 : i32
    %c0_i32_1 = arith.constant 0 : i32
    return %c0_i32, %c0_i32_0 : i32, i32
  }
  func.func @transform_2(%arg0: i32) -> (i32, i32) {
    %c0_i32 = arith.constant 0 : i32
    %c0_i32_0 = arith.constant 0 : i32
    %c0_i32_1 = arith.constant 0 : i32
    return %c0_i32, %c0_i32_0 : i32, i32
  }
  func.func @transform_3(%arg0: i32) -> (i32, i32) {
    %c0_i32 = arith.constant 0 : i32
    %c0_i32_0 = arith.constant 0 : i32
    %c0_i32_1 = arith.constant 0 : i32
    return %c0_i32, %c0_i32_0 : i32, i32
  }
  func.func @transform_4(%arg0: i32) -> (i32, i32) {
    %c0_i32 = arith.constant 0 : i32
    %c0_i32_0 = arith.constant 0 : i32
    %c0_i32_1 = arith.constant 0 : i32
    return %c0_i32, %c0_i32_0 : i32, i32
  }
  func.func @transform_5(%arg0: i32) -> (i32, i32) {
    %c0_i32 = arith.constant 0 : i32
    %c0_i32_0 = arith.constant 0 : i32
    %c0_i32_1 = arith.constant 0 : i32
    return %c0_i32, %c0_i32_0 : i32, i32
  }
  func.func @transform_6(%arg0: i32) -> (i32, i32) {
    %c0_i32 = arith.constant 0 : i32
    %c0_i32_0 = arith.constant 0 : i32
    %c0_i32_1 = arith.constant 0 : i32
    return %c0_i32, %c0_i32_0 : i32, i32
  }
  func.func @transform_7(%arg0: i32) -> (i32, i32) {
    %c0_i32 = arith.constant 0 : i32
    %c0_i32_0 = arith.constant 0 : i32
    return %arg0, %c0_i32 : i32, i32
  }
}

module attributes {stable_mosaic.version = 11 : i64} {
  func.func @_fused_kernel(%arg0: i32, %arg1: memref<8x32xbf16, #tpu.memory_space<vmem>>, %arg2: memref<32x32xbf16, #tpu.memory_space<vmem>>, %arg3: memref<1x32xf32, #tpu.memory_space<vmem>>, %arg4: memref<1x32xf32, #tpu.memory_space<vmem>>, %arg5: memref<1x32xf32, #tpu.memory_space<vmem>>, %arg6: memref<32x128xbf16, #tpu.memory_space<vmem>>, %arg7: memref<1x128xf32, #tpu.memory_space<vmem>>, %arg8: memref<8x128xf32, #tpu.memory_space<vmem>>) attributes {dimension_semantics = [#tpu.dimension_semantics<parallel>], iteration_bounds = array<i64: 1>, scalar_prefetch = 0 : i64, scratch_operands = 0 : i64, tpu.core_type = #tpu.core_type<tc>, window_params = [{transform_indices = @transform_0, window_bounds = array<i64: 8, 32>}, {pipeline_mode = #tpu.pipeline_mode<synchronous>, transform_indices = @transform_1, window_bounds = array<i64: 32, 32>}, {pipeline_mode = #tpu.pipeline_mode<synchronous>, transform_indices = @transform_2, window_bounds = array<i64: 1, 32>}, {pipeline_mode = #tpu.pipeline_mode<synchronous>, transform_indices = @transform_3, window_bounds = array<i64: 1, 32>}, {pipeline_mode = #tpu.pipeline_mode<synchronous>, transform_indices = @transform_4, window_bounds = array<i64: 1, 32>}, {pipeline_mode = #tpu.pipeline_mode<synchronous>, transform_indices = @transform_5, window_bounds = array<i64: 32, 128>}, {pipeline_mode = #tpu.pipeline_mode<synchronous>, transform_indices = @transform_6, window_bounds = array<i64: 1, 128>}, {transform_indices = @transform_7, window_bounds = array<i64: 8, 128>}]} {
    %c0 = arith.constant 0 : index
    %c0_0 = arith.constant 0 : index
    %0 = vector.load %arg1[%c0, %c0_0] : memref<8x32xbf16, #tpu.memory_space<vmem>>, vector<8x32xbf16>
    %c0_1 = arith.constant 0 : index
    %c0_2 = arith.constant 0 : index
    %1 = vector.load %arg2[%c0_1, %c0_2] : memref<32x32xbf16, #tpu.memory_space<vmem>>, vector<32x32xbf16>
    %cst = arith.constant dense<0.000000e+00> : vector<8x32xf32>
    %2 = tpu.matmul %0, %1, %cst {dimension_numbers = #tpu.dot_dimension_numbers<[1], [0], [0], [1], [0, 0, 1, 1], [], []>} : vector<8x32xbf16>, vector<32x32xbf16>, vector<8x32xf32> -> vector<8x32xf32>
    %c0_3 = arith.constant 0 : index
    %c0_4 = arith.constant 0 : index
    %3 = vector.load %arg3[%c0_3, %c0_4] : memref<1x32xf32, #tpu.memory_space<vmem>>, vector<1x32xf32>
    %4 = vector.broadcast %3 : vector<1x32xf32> to vector<8x32xf32>
    %5 = arith.addf %2, %4 : vector<8x32xf32>
    %c0_5 = arith.constant 0 : index
    %c0_6 = arith.constant 0 : index
    %6 = vector.load %arg4[%c0_5, %c0_6] : memref<1x32xf32, #tpu.memory_space<vmem>>, vector<1x32xf32>
    %c0_7 = arith.constant 0 : index
    %c0_8 = arith.constant 0 : index
    %7 = vector.load %arg5[%c0_7, %c0_8] : memref<1x32xf32, #tpu.memory_space<vmem>>, vector<1x32xf32>
    %c0_9 = arith.constant 0 : index
    %c0_10 = arith.constant 0 : index
    %8 = vector.load %arg6[%c0_9, %c0_10] : memref<32x128xbf16, #tpu.memory_space<vmem>>, vector<32x128xbf16>
    %c0_11 = arith.constant 0 : index
    %c0_12 = arith.constant 0 : index
    %9 = vector.load %arg7[%c0_11, %c0_12] : memref<1x128xf32, #tpu.memory_space<vmem>>, vector<1x128xf32>
    %cst_13 = arith.constant dense<0.000000e+00> : vector<8xf32>
    %10 = vector.multi_reduction <add>, %5, %cst_13 [1] : vector<8x32xf32> to vector<8xf32>
    %11 = vector.shape_cast %10 : vector<8xf32> to vector<8x1xf32>
    %cst_14 = arith.constant 3.200000e+01 : f32
    %12 = vector.broadcast %cst_14 : f32 to vector<8x1xf32>
    %13 = arith.divf %11, %12 : vector<8x1xf32>
    %14 = vector.broadcast %13 : vector<8x1xf32> to vector<8x32xf32>
    %15 = arith.subf %5, %14 : vector<8x32xf32>
    %16 = arith.mulf %15, %15 : vector<8x32xf32>
    %cst_15 = arith.constant dense<0.000000e+00> : vector<8xf32>
    %17 = vector.multi_reduction <add>, %16, %cst_15 [1] : vector<8x32xf32> to vector<8xf32>
    %18 = vector.shape_cast %17 : vector<8xf32> to vector<8x1xf32>
    %cst_16 = arith.constant 3.200000e+01 : f32
    %19 = vector.broadcast %cst_16 : f32 to vector<8x1xf32>
    %20 = arith.divf %18, %19 : vector<8x1xf32>
    %cst_17 = arith.constant 9.99999974E-6 : f32
    %21 = vector.broadcast %cst_17 : f32 to vector<8x1xf32>
    %22 = arith.addf %20, %21 : vector<8x1xf32>
    %23 = math.rsqrt %22 : vector<8x1xf32>
    %24 = vector.broadcast %23 : vector<8x1xf32> to vector<8x32xf32>
    %25 = arith.mulf %15, %24 : vector<8x32xf32>
    %26 = vector.broadcast %6 : vector<1x32xf32> to vector<8x32xf32>
    %27 = arith.mulf %25, %26 : vector<8x32xf32>
    %28 = vector.broadcast %7 : vector<1x32xf32> to vector<8x32xf32>
    %29 = arith.addf %27, %28 : vector<8x32xf32>
    %cst_18 = arith.constant 0.000000e+00 : f32
    %30 = vector.broadcast %cst_18 : f32 to vector<8x32xf32>
    %31 = arith.maximumf %29, %30 : vector<8x32xf32>
    %32 = arith.truncf %31 : vector<8x32xf32> to vector<8x32xbf16>
    %cst_19 = arith.constant dense<0.000000e+00> : vector<8x128xf32>
    %33 = tpu.matmul %32, %8, %cst_19 {dimension_numbers = #tpu.dot_dimension_numbers<[1], [0], [0], [1], [0, 0, 1, 1], [], []>} : vector<8x32xbf16>, vector<32x128xbf16>, vector<8x128xf32> -> vector<8x128xf32>
    %34 = vector.broadcast %9 : vector<1x128xf32> to vector<8x128xf32>
    %35 = arith.addf %33, %34 : vector<8x128xf32>
    %c0_20 = arith.constant 0 : index
    %c0_21 = arith.constant 0 : index
    %36 = vector.load %arg8[%c0_20, %c0_21] : memref<8x128xf32, #tpu.memory_space<vmem>>, vector<8x128xf32>
    tpu.vector_store %arg8[%c0_20, %c0_21], %35 {strides = array<i32>} : memref<8x128xf32, #tpu.memory_space<vmem>>, vector<8x128xf32>,
    return
  }
  func.func @transform_0(%arg0: i32) -> (i32, i32) {
    %c0_i32 = arith.constant 0 : i32
    %c0_i32_0 = arith.constant 0 : i32
    return %arg0, %c0_i32 : i32, i32
  }
  func.func @transform_1(%arg0: i32) -> (i32, i32) {
    %c0_i32 = arith.constant 0 : i32
    %c0_i32_0 = arith.constant 0 : i32
    %c0_i32_1 = arith.constant 0 : i32
    return %c0_i32, %c0_i32_0 : i32, i32
  }
  func.func @transform_2(%arg0: i32) -> (i32, i32) {
    %c0_i32 = arith.constant 0 : i32
    %c0_i32_0 = arith.constant 0 : i32
    %c0_i32_1 = arith.constant 0 : i32
    return %c0_i32, %c0_i32_0 : i32, i32
  }
  func.func @transform_3(%arg0: i32) -> (i32, i32) {
    %c0_i32 = arith.constant 0 : i32
    %c0_i32_0 = arith.constant 0 : i32
    %c0_i32_1 = arith.constant 0 : i32
    return %c0_i32, %c0_i32_0 : i32, i32
  }
  func.func @transform_4(%arg0: i32) -> (i32, i32) {
    %c0_i32 = arith.constant 0 : i32
    %c0_i32_0 = arith.constant 0 : i32
    %c0_i32_1 = arith.constant 0 : i32
    return %c0_i32, %c0_i32_0 : i32, i32
  }
  func.func @transform_5(%arg0: i32) -> (i32, i32) {
    %c0_i32 = arith.constant 0 : i32
    %c0_i32_0 = arith.constant 0 : i32
    %c0_i32_1 = arith.constant 0 : i32
    return %c0_i32, %c0_i32_0 : i32, i32
  }
  func.func @transform_6(%arg0: i32) -> (i32, i32) {
    %c0_i32 = arith.constant 0 : i32
    %c0_i32_0 = arith.constant 0 : i32
    %c0_i32_1 = arith.constant 0 : i32
    return %c0_i32, %c0_i32_0 : i32, i32
  }
  func.func @transform_7(%arg0: i32) -> (i32, i32) {
    %c0_i32 = arith.constant 0 : i32
    %c0_i32_0 = arith.constant 0 : i32
    return %arg0, %c0_i32 : i32, i32
  }
}

</mosaic_0001>

<bundles_post_ra>
// kernel: tpu_custom_call.1
= control target key start
LH: loop header
LB: loop body
LE: loop exit
PB: predicated region body
PF: predicated region fallthrough
CT: control target
= control target key end

     0   :  { %12 = vsyncpa [#allocation3], 0  ;;  %s458_s0 = inlined_call_operand.hbm [shape: bf16[8,32], index: 0, kind: input, shape index: {}]   ;;  %s459_s1 = inlined_call_operand.hbm [shape: bf16[32,32], index: 1, kind: input, shape index: {}]   ;;  %s460_s2 = inlined_call_operand.vmem [shape: f32[1,32], index: 2, kind: input, shape index: {}]   ;;  %s461_s3 = inlined_call_operand.vmem [shape: f32[1,32], index: 3, kind: input, shape index: {}]   ;;  %s462_s4 = inlined_call_operand.vmem [shape: f32[1,32], index: 4, kind: input, shape index: {}]   ;;  %s463_s5 = inlined_call_operand.hbm [shape: bf16[32,128], index: 5, kind: input, shape index: {}]   ;;  %s464_s6 = inlined_call_operand.vmem [shape: f32[1,128], index: 6, kind: input, shape index: {}]   ;;  %s465_s7 = inlined_call_operand.hbm [shape: f32[8,128], index: 7, kind: output, shape index: {}]  }
   0x1   :  { %13 = vsyncpa [#allocation6], 0 }
   0x2   :  { %14 = vsyncpa [#allocation4], 0  ;;  %s382_s24 = smov [#allocation5]  }
   0x3   :  { %s30_s25 = sshll.u32 %s382_s24, 4  ;;  %s31_s25 = int_to_ptr.vmem [resolvable:$true] %s30_s25 }
   0x4   :  { %s304_s26 = scalar_lea.vmem %s31_s25, 256  ;;  %p309_p1 = scmp.lt.s32.totalorder %s31_s25, %s31_s25 }
   0x5   :  { %p305_p0 = scmp.ne.s32.totalorder %s31_s25, %s304_s26  ;;  %p310_p2 = scmp.lt.s32.totalorder %s304_s26, %s304_s26 }
   0x7   :  { %p311_p3 = por %p310_p2, %p309_p1 }
   0x9   :  { %p312_p4 = pnand %p311_p3, %p305_p0 }
   0xb   :  { %315 = shalt.err (!%p312_p4)
}
   0xc   :  { %s383_s27 = smov 64   ;;  %s384_s28 = smov 4  }
   0xd   :  { %36 = dma.hbm_to_vmem [thread:$0]  %s459_s1, 256, %s31_s25, [#allocation6], %s383_s27, %s383_s27, %s384_s28  }
   0xe   :  { %s385_s8 = smov [#allocation2]   ;;  %s386_s10 = smov [#allocation7]  }
   0xf   :  { %s21_s9 = sshll.u32 %s385_s8, 4  ;;  %s48_s11 = sshll.u32 %s386_s10, 4  ;;  %s22_s9 = int_to_ptr.vmem [resolvable:$true] %s21_s9  ;;  %s49_s11 = int_to_ptr.vmem [resolvable:$true] %s48_s11 }
  0x10   :  { %s324_s12 = scalar_lea.vmem %s22_s9, 64  ;;  %p329_p6 = scmp.lt.s32.totalorder %s22_s9, %s22_s9 }
  0x11   :  { %p325_p5 = scmp.ne.s32.totalorder %s22_s9, %s324_s12  ;;  %p330_p7 = scmp.lt.s32.totalorder %s324_s12, %s324_s12 }
  0x13   :  { %p331_p8 = por %p330_p7, %p329_p6 }
  0x15   :  { %p332_p9 = pnand %p331_p8, %p325_p5 }
  0x17   :  { %335 = shalt.err (!%p332_p9)
}
  0x18   :  { %24 = dma.hbm_to_vmem [thread:$0]  %s458_s0, 64, %s22_s9, [#allocation3]  }
  0x19   :  { %s344_s15 = scalar_lea.vmem %s49_s11, 256  ;;  %p349_p11 = scmp.lt.s32.totalorder %s49_s11, %s49_s11 }
  0x1a   :  { %p345_p10 = scmp.ne.s32.totalorder %s49_s11, %s344_s15  ;;  %p350_p12 = scmp.lt.s32.totalorder %s344_s15, %s344_s15 }
  0x1c   :  { %p351_p13 = por %p350_p12, %p349_p11 }
  0x1e   :  { %p352_p0 = pnand %p351_p13, %p345_p10 }
  0x20   :  { %355 = shalt.err (!%p352_p0)
}
  0x21   :  { %54 = dma.hbm_to_vmem [thread:$0]  %s463_s5, 256, %s49_s11, [#allocation6], %s383_s27, %s383_s27, %s384_s28  }
  0x22   :  { %376 = dma.done.wait [#allocation3], 64  }
  0x23   :  { %377 = vsyncadd [#allocation3], 4294967232 }
  0x24   :  { %378 = dma.done.wait [#allocation6], 512  }
  0x25   :  { %379 = vsyncadd [#allocation6], 4294966784  ;;  %v387_v0 = vmov 0.0   ;;  %vm388_vm0 = vmmov 0   ;;  %v290_v1 = vld [vmem:[#allocation5 + $0x8] sm:$0xff]   ;;  %v291_v2 = vld [vmem:[#allocation5] sm:$0xff]  }
  0x26   :  { %266 = vmatprep.subr.bf16.mxu0 %v387_v0  ;;  %270 = vmatprep.mubr.msk.bf16.mxu0 %vm388_vm0, %v387_v0  ;;  %v67_v3 = vld [vmem:[#allocation2] sm:$0xf]  ;;  %vm91_vm1 = vcmask 261120   ;;  %v293_v17 = vld [vmem:[#allocation7] sm:$0xff]   ;;  %s389_s22 = smov [#allocation8]  }
  0x27   :  { %274 = vmatprep.subr.bf16.mxu1 %v387_v0  ;;  %278 = vmatprep.mubr.msk.bf16.mxu1 %vm388_vm0, %v387_v0  ;;  %v250_v4 = vld [vmem:[%s460_s2] ss:$0 sm:$0xff]  ;;  %s240_s23 = sshll.u32 %s389_s22, 4  ;;  %s241_s23 = int_to_ptr.vmem [resolvable:$true] %s240_s23 }
  0x28   :  { %267 = vmatpush3.bf16.msra.mxu0 %v290_v1  ;;  %v292_v16 = vld [vmem:[#allocation7 + $0x8] sm:$0xff]   ;;  %p361_p2 = scmp.lt.s32.totalorder %s241_s23, %s241_s23 }
  0x29   :  { %268 = vmatprep.subr.bf16.mxu0 %v387_v0  ;;  %275 = vmatpush3.bf16.msra.mxu1 %v292_v16  ;;  %v254_v22 = vld [vmem:[%s461_s3] ss:$0 sm:$0xff]  ;;  %s356_s3 = scalar_lea.vmem %s241_s23, 128 }
  0x2a   :  { %276 = vmatprep.subr.bf16.mxu1 %v387_v0  ;;  %v255_v24 = vld [vmem:[%s462_s4] ss:$0 sm:$0xff]  ;;  %p357_p1 = scmp.ne.s32.totalorder %s241_s23, %s356_s3  ;;  %p362_p3 = scmp.lt.s32.totalorder %s356_s3, %s356_s3 }
  0x2b   :  { %v256_v29 = vld [vmem:[%s464_s6] ss:$0 sm:$0xff] }
  0x2c   :  { %269 = vmatpush3.bf16.msra.mxu0 %v291_v2  ;;  %p363_p4 = por %p362_p3, %p361_p2 }
  0x2d   :  { %277 = vmatpush3.bf16.msra.mxu1 %v293_v17 }
  0x2e   :  { %p364_p5 = pnand %p363_p4, %p357_p1 }
  0x2f   :  { %271 = vmatmul.mubr.msk.bf16.vlgmr.msra.gmra.mxu0 %vm91_vm1, %v67_v3 }
  0xef   :  { %v129_v5 = vpop.f32.mrf.mxu0 }
  0xf0   :  { %v130_v6 = vadd.f32 %v250_v4, %v129_v5 }
  0xf1   :  { %v272_v7 = vpop.f32.mrf.mxu0 }
  0xf2   :  { %v142_v8 = vsel %vm91_vm1, %v130_v6, 0.0 }
  0xf3   :  { %143 = vadd.xlane.f32.xlu0 %v142_v8  ;;  %v132_v9 = vpop.f32.mrf.mxu0 }
  0xf5   :  { %v273_v10 = vpop.f32.mrf.mxu0 }
 0x17c   :  { %v144_v11 = vpop.xlane.xlu0 %143 }
 0x17d   :  { %v146_v12 = vmul.f32 0.03125, %v144_v11 }
 0x17f   :  { %v147_v13 = vsub.f32 %v130_v6, %v146_v12 }
 0x181   :  { %v148_v14 = vmul.f32 %v147_v13, %v147_v13 }
 0x183   :  { %v149_v15 = vsel %vm91_vm1, %v148_v14, 0.0 }
 0x184   :  { %150 = vadd.xlane.f32.xlu0 %v149_v15 }
 0x20d   :  { %v151_v18 = vpop.xlane.xlu0 %150 }
 0x20e   :  { %v152_v19 = vmul.f32 0.03125, %v151_v18 }
 0x210   :  { %v153_v20 = vadd.f32 1e-05, %v152_v19 }
 0x212   :  { %294 = vrsqrt.f32 %v153_v20 }
 0x21f   :  { %v295_v21 = vpop.eup %294 }
 0x220   :  { %v155_v23 = vmul.f32 %v295_v21, %v147_v13 }
 0x222   :  { %v162_v25 = vmul.f32 %v254_v22, %v155_v23 }
 0x224   :  { %v169_v26 = vadd.f32 %v255_v24, %v162_v25 }
 0x226   :  { %v170_v27 = vmax.f32 %v169_v26, 0.0 }
 0x228   :  { %v171_v28 = vpack.c.bf16 %v170_v27, %v170_v27 }
 0x22a   :  { %279 = vmatmul.mubr.msk.bf16.vlgmr.msra.gmra.mxu1 %vm91_vm1, %v171_v28 }
 0x2ea   :  { %v227_v30 = vpop.f32.mrf.mxu1 }
 0x2eb   :  { %v228_v31 = vadd.f32 %v256_v29, %v227_v30 }
 0x2ec   :  { %v280_v32 = vpop.f32.mrf.mxu1 }
 0x2ed   :  { %233 = vst [vmem:[#allocation8] sm:$0xff] %v228_v31 }
 0x2ee   :  { %v230_v33 = vpop.f32.mrf.mxu1 }
 0x2ef   :  { %367 = shalt.err (!%p364_p5)
}
 0x2f0   :  { %243 = dma.vmem_to_hbm [thread:$0]  %s241_s23, 128, %s465_s7, [#allocation4]   ;;  %v281_v34 = vpop.f32.mrf.mxu1 }
 0x2f1   :  { %380 = dma.done.wait [#allocation4], 128  }
 0x2f2   :  { %381 = vsyncadd [#allocation4], 4294967168 }
 0x2f3   :  { %247 = vsyncpa [#allocation3], 1 }
 0x2f4   :  { %248 = vsyncpa [#allocation6], 1 }
 0x2f5   :  { %249 = vsyncpa [#allocation4], 1 }

// kernel: tpu_custom_call.1
= control target key start
LH: loop header
LB: loop body
LE: loop exit
PB: predicated region body
PF: predicated region fallthrough
CT: control target
= control target key end

     0   :  { %12 = vsyncpa [#allocation3], 0  ;;  %s458_s0 = inlined_call_operand.hbm [shape: bf16[8,32], index: 0, kind: input, shape index: {}]   ;;  %s459_s1 = inlined_call_operand.hbm [shape: bf16[32,32], index: 1, kind: input, shape index: {}]   ;;  %s460_s2 = inlined_call_operand.vmem [shape: f32[1,32], index: 2, kind: input, shape index: {}]   ;;  %s461_s3 = inlined_call_operand.vmem [shape: f32[1,32], index: 3, kind: input, shape index: {}]   ;;  %s462_s4 = inlined_call_operand.vmem [shape: f32[1,32], index: 4, kind: input, shape index: {}]   ;;  %s463_s5 = inlined_call_operand.hbm [shape: bf16[32,128], index: 5, kind: input, shape index: {}]   ;;  %s464_s6 = inlined_call_operand.vmem [shape: f32[1,128], index: 6, kind: input, shape index: {}]   ;;  %s465_s7 = inlined_call_operand.hbm [shape: f32[8,128], index: 7, kind: output, shape index: {}]  }
   0x1   :  { %13 = vsyncpa [#allocation6], 0 }
   0x2   :  { %14 = vsyncpa [#allocation4], 0  ;;  %s382_s24 = smov [#allocation5]  }
   0x3   :  { %s30_s25 = sshll.u32 %s382_s24, 4  ;;  %s31_s25 = int_to_ptr.vmem [resolvable:$true] %s30_s25 }
   0x4   :  { %s304_s26 = scalar_lea.vmem %s31_s25, 256  ;;  %p309_p1 = scmp.lt.s32.totalorder %s31_s25, %s31_s25 }
   0x5   :  { %p305_p0 = scmp.ne.s32.totalorder %s31_s25, %s304_s26  ;;  %p310_p2 = scmp.lt.s32.totalorder %s304_s26, %s304_s26 }
   0x7   :  { %p311_p3 = por %p310_p2, %p309_p1 }
   0x9   :  { %p312_p4 = pnand %p311_p3, %p305_p0 }
   0xb   :  { %315 = shalt.err (!%p312_p4)
}
   0xc   :  { %s383_s27 = smov 64   ;;  %s384_s28 = smov 4  }
   0xd   :  { %36 = dma.hbm_to_vmem [thread:$0]  %s459_s1, 256, %s31_s25, [#allocation6], %s383_s27, %s383_s27, %s384_s28  }
   0xe   :  { %s385_s8 = smov [#allocation2]   ;;  %s386_s10 = smov [#allocation7]  }
   0xf   :  { %s21_s9 = sshll.u32 %s385_s8, 4  ;;  %s48_s11 = sshll.u32 %s386_s10, 4  ;;  %s22_s9 = int_to_ptr.vmem [resolvable:$true] %s21_s9  ;;  %s49_s11 = int_to_ptr.vmem [resolvable:$true] %s48_s11 }
  0x10   :  { %s324_s12 = scalar_lea.vmem %s22_s9, 64  ;;  %p329_p6 = scmp.lt.s32.totalorder %s22_s9, %s22_s9 }
  0x11   :  { %p325_p5 = scmp.ne.s32.totalorder %s22_s9, %s324_s12  ;;  %p330_p7 = scmp.lt.s32.totalorder %s324_s12, %s324_s12 }
  0x13   :  { %p331_p8 = por %p330_p7, %p329_p6 }
  0x15   :  { %p332_p9 = pnand %p331_p8, %p325_p5 }
  0x17   :  { %335 = shalt.err (!%p332_p9)
}
  0x18   :  { %24 = dma.hbm_to_vmem [thread:$0]  %s458_s0, 64, %s22_s9, [#allocation3]  }
  0x19   :  { %s344_s15 = scalar_lea.vmem %s49_s11, 256  ;;  %p349_p11 = scmp.lt.s32.totalorder %s49_s11, %s49_s11 }
  0x1a   :  { %p345_p10 = scmp.ne.s32.totalorder %s49_s11, %s344_s15  ;;  %p350_p12 = scmp.lt.s32.totalorder %s344_s15, %s344_s15 }
  0x1c   :  { %p351_p13 = por %p350_p12, %p349_p11 }
  0x1e   :  { %p352_p0 = pnand %p351_p13, %p345_p10 }
  0x20   :  { %355 = shalt.err (!%p352_p0)
}
  0x21   :  { %54 = dma.hbm_to_vmem [thread:$0]  %s463_s5, 256, %s49_s11, [#allocation6], %s383_s27, %s383_s27, %s384_s28  }
  0x22   :  { %376 = dma.done.wait [#allocation3], 64  }
  0x23   :  { %377 = vsyncadd [#allocation3], 4294967232 }
  0x24   :  { %378 = dma.done.wait [#allocation6], 512  }
  0x25   :  { %379 = vsyncadd [#allocation6], 4294966784  ;;  %v387_v0 = vmov 0.0   ;;  %vm388_vm0 = vmmov 0   ;;  %v290_v1 = vld [vmem:[#allocation5 + $0x8] sm:$0xff]   ;;  %v291_v2 = vld [vmem:[#allocation5] sm:$0xff]  }
  0x26   :  { %266 = vmatprep.subr.bf16.mxu0 %v387_v0  ;;  %270 = vmatprep.mubr.msk.bf16.mxu0 %vm388_vm0, %v387_v0  ;;  %v67_v3 = vld [vmem:[#allocation2] sm:$0xf]  ;;  %vm91_vm1 = vcmask 261120   ;;  %v293_v17 = vld [vmem:[#allocation7] sm:$0xff]   ;;  %s389_s22 = smov [#allocation8]  }
  0x27   :  { %274 = vmatprep.subr.bf16.mxu1 %v387_v0  ;;  %278 = vmatprep.mubr.msk.bf16.mxu1 %vm388_vm0, %v387_v0  ;;  %v250_v4 = vld [vmem:[%s460_s2] ss:$0 sm:$0xff]  ;;  %s240_s23 = sshll.u32 %s389_s22, 4  ;;  %s241_s23 = int_to_ptr.vmem [resolvable:$true] %s240_s23 }
  0x28   :  { %267 = vmatpush3.bf16.msra.mxu0 %v290_v1  ;;  %v292_v16 = vld [vmem:[#allocation7 + $0x8] sm:$0xff]   ;;  %p361_p2 = scmp.lt.s32.totalorder %s241_s23, %s241_s23 }
  0x29   :  { %268 = vmatprep.subr.bf16.mxu0 %v387_v0  ;;  %275 = vmatpush3.bf16.msra.mxu1 %v292_v16  ;;  %v254_v22 = vld [vmem:[%s461_s3] ss:$0 sm:$0xff]  ;;  %s356_s3 = scalar_lea.vmem %s241_s23, 128 }
  0x2a   :  { %276 = vmatprep.subr.bf16.mxu1 %v387_v0  ;;  %v255_v24 = vld [vmem:[%s462_s4] ss:$0 sm:$0xff]  ;;  %p357_p1 = scmp.ne.s32.totalorder %s241_s23, %s356_s3  ;;  %p362_p3 = scmp.lt.s32.totalorder %s356_s3, %s356_s3 }
  0x2b   :  { %v256_v29 = vld [vmem:[%s464_s6] ss:$0 sm:$0xff] }
  0x2c   :  { %269 = vmatpush3.bf16.msra.mxu0 %v291_v2  ;;  %p363_p4 = por %p362_p3, %p361_p2 }
  0x2d   :  { %277 = vmatpush3.bf16.msra.mxu1 %v293_v17 }
  0x2e   :  { %p364_p5 = pnand %p363_p4, %p357_p1 }
  0x2f   :  { %271 = vmatmul.mubr.msk.bf16.vlgmr.msra.gmra.mxu0 %vm91_vm1, %v67_v3 }
  0xef   :  { %v129_v5 = vpop.f32.mrf.mxu0 }
  0xf0   :  { %v130_v6 = vadd.f32 %v250_v4, %v129_v5 }
  0xf1   :  { %v272_v7 = vpop.f32.mrf.mxu0 }
  0xf2   :  { %v142_v8 = vsel %vm91_vm1, %v130_v6, 0.0 }
  0xf3   :  { %143 = vadd.xlane.f32.xlu0 %v142_v8  ;;  %v132_v9 = vpop.f32.mrf.mxu0 }
  0xf5   :  { %v273_v10 = vpop.f32.mrf.mxu0 }
 0x17c   :  { %v144_v11 = vpop.xlane.xlu0 %143 }
 0x17d   :  { %v146_v12 = vmul.f32 0.03125, %v144_v11 }
 0x17f   :  { %v147_v13 = vsub.f32 %v130_v6, %v146_v12 }
 0x181   :  { %v148_v14 = vmul.f32 %v147_v13, %v147_v13 }
 0x183   :  { %v149_v15 = vsel %vm91_vm1, %v148_v14, 0.0 }
 0x184   :  { %150 = vadd.xlane.f32.xlu0 %v149_v15 }
 0x20d   :  { %v151_v18 = vpop.xlane.xlu0 %150 }
 0x20e   :  { %v152_v19 = vmul.f32 0.03125, %v151_v18 }
 0x210   :  { %v153_v20 = vadd.f32 1e-05, %v152_v19 }
 0x212   :  { %294 = vrsqrt.f32 %v153_v20 }
 0x21f   :  { %v295_v21 = vpop.eup %294 }
 0x220   :  { %v155_v23 = vmul.f32 %v295_v21, %v147_v13 }
 0x222   :  { %v162_v25 = vmul.f32 %v254_v22, %v155_v23 }
 0x224   :  { %v169_v26 = vadd.f32 %v255_v24, %v162_v25 }
 0x226   :  { %v170_v27 = vmax.f32 %v169_v26, 0.0 }
 0x228   :  { %v171_v28 = vpack.c.bf16 %v170_v27, %v170_v27 }
 0x22a   :  { %279 = vmatmul.mubr.msk.bf16.vlgmr.msra.gmra.mxu1 %vm91_vm1, %v171_v28 }
 0x2ea   :  { %v227_v30 = vpop.f32.mrf.mxu1 }
 0x2eb   :  { %v228_v31 = vadd.f32 %v256_v29, %v227_v30 }
 0x2ec   :  { %v280_v32 = vpop.f32.mrf.mxu1 }
 0x2ed   :  { %233 = vst [vmem:[#allocation8] sm:$0xff] %v228_v31 }
 0x2ee   :  { %v230_v33 = vpop.f32.mrf.mxu1 }
 0x2ef   :  { %367 = shalt.err (!%p364_p5)
}
 0x2f0   :  { %243 = dma.vmem_to_hbm [thread:$0]  %s241_s23, 128, %s465_s7, [#allocation4]   ;;  %v281_v34 = vpop.f32.mrf.mxu1 }
 0x2f1   :  { %380 = dma.done.wait [#allocation4], 128  }
 0x2f2   :  { %381 = vsyncadd [#allocation4], 4294967168 }
 0x2f3   :  { %247 = vsyncpa [#allocation3], 1 }
 0x2f4   :  { %248 = vsyncpa [#allocation6], 1 }
 0x2f5   :  { %249 = vsyncpa [#allocation4], 1 }

</bundles_post_ra>
